<compile_context>
chip_gen: v5e
topology: v5e:2x2
jax: 0.10.0
libtpu: 0.0.40
codegen_flags: <defaults>
</compile_context>

<pallas_src>
import functools

import jax
import jax.numpy as jnp
from jax.experimental import pallas as pl
from jax.experimental.pallas import tpu as pltpu

LN_EPS = 1e-5


def _ln_expand_shuffle_kernel(x_ref, gamma_ref, beta_ref, w_ref, o_ref):
    """LayerNorm(C) -> x @ W (C -> 16C) -> fused 4x4 pixel-shuffle store.

    x_ref     : (th, W, C)       chunk of th image rows (th*W tokens)
    gamma_ref : (1, C)           LayerNorm weight
    beta_ref  : (1, C)           LayerNorm bias
    w_ref     : (C, 16*C)        expand weight (transposed torch weight), bf16
    o_ref     : (th, 4, W, 4*C)  output chunk; row-major (h_local, p1, w, (p2 c))
                                 == the module's '(h p1)(w p2) c' layout
    """
    th, W, C = x_ref.shape
    C4 = 4 * C

    # ---- LayerNorm in f32 (biased variance, matches torch.nn.LayerNorm) ----
    x = x_ref[...].astype(jnp.float32).reshape(th * W, C)
    mean = jnp.mean(x, axis=-1, keepdims=True)
    xc = x - mean
    var = jnp.mean(xc * xc, axis=-1, keepdims=True)
    xn = xc * jax.lax.rsqrt(var + LN_EPS)
    xn = xn * gamma_ref[...].astype(jnp.float32) + beta_ref[...].astype(jnp.float32)
    # Single cast to the weight dtype (bf16), reused for all 4 sub-matmuls.
    xn = xn.astype(w_ref.dtype)

    # ---- Expand + pixel-shuffle, split per p1 --------------------------------
    # Weight columns are ordered (p1, p2, c); slicing the weight (not the
    # result) keeps the live f32 intermediate at (th*W, 4C) instead of
    # (th*W, 16C) and lets each p1 store overlap the next MXU push.
    # NOTE: the (th*W, 4C)->(th, W, 4C) reshape is a free view only when
    # W % 8 == 0 (typical Swin resolutions); otherwise it costs a relayout
    # per p1 per step (correctness is unaffected).
    for p1 in range(4):
        w_p1 = w_ref[:, p1 * C4:(p1 + 1) * C4]                  # (C, 4C) static slice
        y = jnp.dot(xn, w_p1, preferred_element_type=jnp.float32)  # (th*W, 4C) f32
        o_ref[:, p1, :, :] = y.reshape(th, W, C4).astype(o_ref.dtype)


def _vmem_capacity_bytes():
    """Best-effort VMEM capacity query; falls back to the smallest (v7x)."""
    try:
        info = pltpu.get_tpu_info()
        for name in ("vmem_capacity_bytes", "vmem_size_bytes", "vmem_bytes"):
            cap = getattr(info, name, None)
            if cap:
                return int(cap)
    except Exception:
        pass
    try:
        kind = jax.devices()[0].device_kind.lower()
        if any(tag in kind for tag in ("v5 lite", "v5e", "v5p", "v6")):
            return 128 * 1024 * 1024
    except Exception:
        pass
    return 64 * 1024 * 1024  # conservative: v7x / unknown


def _pick_tiling(n_rows, W, C, x_itemsize, w_itemsize, out_itemsize):
    """Pick rows-per-block `th`, grid length and an explicit VMEM limit."""
    vmem_cap = _vmem_capacity_bytes()
    if vmem_cap >= 100 * 1024 * 1024:
        # v5e / v6e: 128 MiB physical VMEM -> large blocks amortize the
        # ~0.35 us/step pipeline overhead; purely writeback-bound there.
        budget = 90 * 1024 * 1024
        limit_cap = 110 * 1024 * 1024
        target_tokens = 2048
    else:
        # v7x (64 MiB) or unknown: stay conservative but still ~1K tokens.
        budget = 30 * 1024 * 1024
        limit_cap = 48 * 1024 * 1024
        target_tokens = 1024

    th = max(1, min(n_rows, max(1, target_tokens // max(W, 1))))

    def vmem_bytes(t):
        inp = 2 * t * W * C * x_itemsize                 # double-buffered input
        out = 2 * t * 16 * W * C * out_itemsize          # double-buffered output
        wgt = 2 * C * 16 * C * w_itemsize                # resident weight buffers
        prm = 8 * C * 4                                  # gamma / beta buffers
        xn = t * W * C * (4 + w_itemsize)                # f32 LN temp + bf16 cast
        acc = t * W * 4 * C * 4                          # one p1-wide f32 result
        return inp + out + wgt + prm + xn + acc

    while th > 1 and vmem_bytes(th) > budget:
        th = max(1, th // 2)

    # Balance the grid: an even number of near-equal steps keeps both of
    # v7x's TensorCores busy and avoids a tiny trailing block.
    if n_rows >= 2:
        n_steps = pl.cdiv(n_rows, th)
        n_steps = max(2, n_steps)
        if n_steps % 2:
            n_steps += 1
        th = max(1, pl.cdiv(n_rows, n_steps))

    est = vmem_bytes(th)
    vmem_limit = int(min(limit_cap, max(2 * est, 16 * 1024 * 1024)))
    return th, vmem_limit


def _ln_expand_shuffle(x3, gamma, beta, w, out_dtype):
    """x3: (B*H, W, C) -> (B*H, 4, W, 4*C) fused LN + expand + pixel-shuffle."""
    n_rows, W, C = x3.shape
    C16 = w.shape[1]

    th, vmem_limit = _pick_tiling(n_rows, W, C, x3.dtype.itemsize,
                                  w.dtype.itemsize,
                                  jnp.dtype(out_dtype).itemsize)
    grid = (pl.cdiv(n_rows, th),)

    # NOTE: gamma/beta/weight use constant index maps, so Pallas never
    # re-DMAs them across grid steps.  (Single-buffering them via
    # pipeline_mode=pl.Buffered(1) would save one extra resident copy of the
    # bf16 weight; omitted here to keep lowering portable across versions.)
    return pl.pallas_call(
        _ln_expand_shuffle_kernel,
        out_shape=jax.ShapeDtypeStruct((n_rows, 4, W, 4 * C), out_dtype),
        grid=grid,
        in_specs=[
            pl.BlockSpec((th, W, C), lambda i: (i, 0, 0)),    # token rows
            pl.BlockSpec((1, C), lambda i: (0, 0)),           # gamma (resident)
            pl.BlockSpec((1, C), lambda i: (0, 0)),           # beta  (resident)
            pl.BlockSpec((C, C16), lambda i: (0, 0)),         # weight (resident)
        ],
        out_specs=pl.BlockSpec((th, 4, W, 4 * C), lambda i: (i, 0, 0, 0)),
        compiler_params=pltpu.CompilerParams(
            dimension_semantics=("parallel",),
            vmem_limit_bytes=vmem_limit),
    )(x3, gamma, beta, w)


def final_patch_expand_x4(x, params, input_resolution, dim_scale=4,
                          out_dtype=None, use_bf16_weight=True):
    """x: (B, H*W, C) -> (B, dim_scale**2 * H*W, C)."""
    assert dim_scale == 4, "kernel is specialized to the module's 4x4 expand"
    H, W = input_resolution
    B, L, C = x.shape
    if L != H * W:
        # Same square-resolution fallback (int truncation) as the PyTorch module.
        # TODO(synk): non-square / non-perfect-square L silently reshapes wrong,
        # exactly like the original module.
        new_res = int(L ** 0.5)
        H, W = new_res, new_res

    gamma, beta, w = params["gamma"], params["beta"], params["w_expand"]
    assert w.shape == (C, 16 * C)

    # Guarantee the bf16 MXU path: one-time cast of the weight in the wrapper.
    if use_bf16_weight and w.dtype == jnp.float32:
        w = w.astype(jnp.bfloat16)

    if out_dtype is None:
        out_dtype = x.dtype                    # pass jnp.bfloat16 to halve writeback

    n_rows = B * H
    x3 = x.reshape(n_rows, W, C)               # metadata-only reshape

    out4 = _ln_expand_shuffle(x3, gamma, beta, w, out_dtype)   # (B*H, 4, W, 4C)

    # Row-major order of out4 is (b, h, p1, w, p2, c) == '(h p1)(w p2) c',
    # so this reshape is metadata-only — no extra HBM traffic.
    return out4.reshape(B, 16 * H * W, C)


def make_params(dim, key):
    """Deterministic synthetic parameters (shapes from the module __init__)."""
    (k_w,) = jax.random.split(key, 1)
    # torch Linear(dim, 16*dim, bias=False).weight has shape (16*dim, dim);
    # store its transpose so the kernel computes x @ W^T directly.
    w = jax.random.normal(k_w, (dim, 16 * dim), dtype=jnp.float32) * 0.02
    gamma = jnp.ones((1, dim), dtype=jnp.float32)   # LayerNorm default init
    beta = jnp.zeros((1, dim), dtype=jnp.float32)
    return {"w_expand": w, "gamma": gamma, "beta": beta}


def _reference(x, params, input_resolution, dim_scale=4):
    """Pure-JAX f32 reference for a sanity check."""
    H, W = input_resolution
    B, L, C = x.shape
    mean = jnp.mean(x, axis=-1, keepdims=True)
    var = jnp.mean((x - mean) ** 2, axis=-1, keepdims=True)
    xn = (x - mean) / jnp.sqrt(var + LN_EPS)
    xn = xn * params["gamma"][0] + params["beta"][0]
    y = xn @ params["w_expand"]
    C16 = y.shape[-1]
    p = dim_scale
    y = y.reshape(B, H, W, p, p, C16 // (p * p))
    y = jnp.transpose(y, (0, 1, 3, 2, 4, 5)).reshape(B, H * p, W * p, -1)
    return y.reshape(B, -1, C)


if __name__ == "__main__":
    # Small shapes consistent with the module: B=2, H=W=8 (L=64), dim=32.
    B, H, W, dim = 2, 8, 8, 32
    key = jax.random.PRNGKey(0)
    kx, kp = jax.random.split(key)
    x = jax.random.normal(kx, (B, H * W, dim), dtype=jnp.float32)
    params = make_params(dim, kp)

    fn = jax.jit(functools.partial(final_patch_expand_x4,
                                   input_resolution=(H, W)))
    out = jax.block_until_ready(fn(x, params))

    assert out.shape == (B, 16 * H * W, dim), out.shape

    ref = _reference(x, params, (H, W))
    # The kernel runs the matmul on the bf16 MXU path (f32 accumulation), so
    # compare against the f32 reference at bf16-rounding tolerance.
    assert jnp.allclose(out, ref, atol=2e-2, rtol=2e-2)

    print("KERNEL_OK")
</pallas_src>

<mosaic_0001>
module attributes {stable_mosaic.version = 11 : i64} {
  func.func @_ln_expand_shuffle_kernel(%arg0: i32, %arg1: memref<8x8x32xf32, #tpu.memory_space<vmem>>, %arg2: memref<1x32xf32, #tpu.memory_space<vmem>>, %arg3: memref<1x32xf32, #tpu.memory_space<vmem>>, %arg4: memref<32x512xbf16, #tpu.memory_space<vmem>>, %arg5: memref<8x4x8x128xf32, #tpu.memory_space<vmem>>) attributes {dimension_semantics = [#tpu.dimension_semantics<parallel>], iteration_bounds = array<i64: 2>, scalar_prefetch = 0 : i64, scratch_operands = 0 : i64, tpu.core_type = #tpu.core_type<tc>, window_params = [{transform_indices = @transform_0, window_bounds = array<i64: 8, 8, 32>}, {pipeline_mode = #tpu.pipeline_mode<synchronous>, transform_indices = @transform_1, window_bounds = array<i64: 1, 32>}, {pipeline_mode = #tpu.pipeline_mode<synchronous>, transform_indices = @transform_2, window_bounds = array<i64: 1, 32>}, {pipeline_mode = #tpu.pipeline_mode<synchronous>, transform_indices = @transform_3, window_bounds = array<i64: 32, 512>}, {transform_indices = @transform_4, window_bounds = array<i64: 8, 4, 8, 128>}]} {
    %c0 = arith.constant 0 : index
    %c0_0 = arith.constant 0 : index
    %c0_1 = arith.constant 0 : index
    %0 = vector.load %arg1[%c0, %c0_0, %c0_1] : memref<8x8x32xf32, #tpu.memory_space<vmem>>, vector<8x8x32xf32>
    %1 = vector.shape_cast %0 : vector<8x8x32xf32> to vector<64x32xf32>
    %cst = arith.constant dense<0.000000e+00> : vector<64xf32>
    %2 = vector.multi_reduction <add>, %1, %cst [1] : vector<64x32xf32> to vector<64xf32>
    %3 = vector.shape_cast %2 : vector<64xf32> to vector<64x1xf32>
    %cst_2 = arith.constant 3.200000e+01 : f32
    %4 = vector.broadcast %cst_2 : f32 to vector<64x1xf32>
    %5 = arith.divf %3, %4 : vector<64x1xf32>
    %6 = vector.broadcast %5 : vector<64x1xf32> to vector<64x32xf32>
    %7 = arith.subf %1, %6 : vector<64x32xf32>
    %8 = arith.mulf %7, %7 : vector<64x32xf32>
    %cst_3 = arith.constant dense<0.000000e+00> : vector<64xf32>
    %9 = vector.multi_reduction <add>, %8, %cst_3 [1] : vector<64x32xf32> to vector<64xf32>
    %10 = vector.shape_cast %9 : vector<64xf32> to vector<64x1xf32>
    %cst_4 = arith.constant 3.200000e+01 : f32
    %11 = vector.broadcast %cst_4 : f32 to vector<64x1xf32>
    %12 = arith.divf %10, %11 : vector<64x1xf32>
    %cst_5 = arith.constant 9.99999974E-6 : f32
    %13 = vector.broadcast %cst_5 : f32 to vector<64x1xf32>
    %14 = arith.addf %12, %13 : vector<64x1xf32>
    %15 = math.rsqrt %14 : vector<64x1xf32>
    %16 = vector.broadcast %15 : vector<64x1xf32> to vector<64x32xf32>
    %17 = arith.mulf %7, %16 : vector<64x32xf32>
    %c0_6 = arith.constant 0 : index
    %c0_7 = arith.constant 0 : index
    %18 = vector.load %arg2[%c0_6, %c0_7] : memref<1x32xf32, #tpu.memory_space<vmem>>, vector<1x32xf32>
    %19 = vector.broadcast %18 : vector<1x32xf32> to vector<64x32xf32>
    %20 = arith.mulf %17, %19 : vector<64x32xf32>
    %c0_8 = arith.constant 0 : index
    %c0_9 = arith.constant 0 : index
    %21 = vector.load %arg3[%c0_8, %c0_9] : memref<1x32xf32, #tpu.memory_space<vmem>>, vector<1x32xf32>
    %22 = vector.broadcast %21 : vector<1x32xf32> to vector<64x32xf32>
    %23 = arith.addf %20, %22 : vector<64x32xf32>
    %24 = arith.truncf %23 : vector<64x32xf32> to vector<64x32xbf16>
    %c0_10 = arith.constant 0 : index
    %c0_11 = arith.constant 0 : index
    %25 = vector.load %arg4[%c0_10, %c0_11] : memref<32x512xbf16, #tpu.memory_space<vmem>>, vector<32x128xbf16>
    %cst_12 = arith.constant dense<0.000000e+00> : vector<64x128xf32>
    %26 = tpu.matmul %24, %25, %cst_12 {dimension_numbers = #tpu.dot_dimension_numbers<[1], [0], [0], [1], [0, 0, 1, 1], [], []>} : vector<64x32xbf16>, vector<32x128xbf16>, vector<64x128xf32> -> vector<64x128xf32>
    %27 = vector.shape_cast %26 : vector<64x128xf32> to vector<8x8x128xf32>
    %c0_13 = arith.constant 0 : index
    %c0_14 = arith.constant 0 : index
    %c0_15 = arith.constant 0 : index
    %c0_16 = arith.constant 0 : index
    %28 = vector.load %arg5[%c0_13, %c0_14, %c0_15, %c0_16] : memref<8x4x8x128xf32, #tpu.memory_space<vmem>>, vector<8x1x8x128xf32>
    %29 = vector.shape_cast %28 : vector<8x1x8x128xf32> to vector<8x8x128xf32>
    %30 = vector.shape_cast %27 : vector<8x8x128xf32> to vector<8x1x8x128xf32>
    tpu.vector_store %arg5[%c0_13, %c0_14, %c0_15, %c0_16], %30 {strides = array<i32>} : memref<8x4x8x128xf32, #tpu.memory_space<vmem>>, vector<8x1x8x128xf32>,
    %c0_17 = arith.constant 0 : index
    %c128 = arith.constant 128 : index
    %31 = vector.load %arg4[%c0_17, %c128] : memref<32x512xbf16, #tpu.memory_space<vmem>>, vector<32x128xbf16>
    %cst_18 = arith.constant dense<0.000000e+00> : vector<64x128xf32>
    %32 = tpu.matmul %24, %31, %cst_18 {dimension_numbers = #tpu.dot_dimension_numbers<[1], [0], [0], [1], [0, 0, 1, 1], [], []>} : vector<64x32xbf16>, vector<32x128xbf16>, vector<64x128xf32> -> vector<64x128xf32>
    %33 = vector.shape_cast %32 : vector<64x128xf32> to vector<8x8x128xf32>
    %c0_19 = arith.constant 0 : index
    %c1 = arith.constant 1 : index
    %c0_20 = arith.constant 0 : index
    %c0_21 = arith.constant 0 : index
    %34 = vector.load %arg5[%c0_19, %c1, %c0_20, %c0_21] : memref<8x4x8x128xf32, #tpu.memory_space<vmem>>, vector<8x1x8x128xf32>
    %35 = vector.shape_cast %34 : vector<8x1x8x128xf32> to vector<8x8x128xf32>
    %36 = vector.shape_cast %33 : vector<8x8x128xf32> to vector<8x1x8x128xf32>
    tpu.vector_store %arg5[%c0_19, %c1, %c0_20, %c0_21], %36 {strides = array<i32>} : memref<8x4x8x128xf32, #tpu.memory_space<vmem>>, vector<8x1x8x128xf32>,
    %c0_22 = arith.constant 0 : index
    %c256 = arith.constant 256 : index
    %37 = vector.load %arg4[%c0_22, %c256] : memref<32x512xbf16, #tpu.memory_space<vmem>>, vector<32x128xbf16>
    %cst_23 = arith.constant dense<0.000000e+00> : vector<64x128xf32>
    %38 = tpu.matmul %24, %37, %cst_23 {dimension_numbers = #tpu.dot_dimension_numbers<[1], [0], [0], [1], [0, 0, 1, 1], [], []>} : vector<64x32xbf16>, vector<32x128xbf16>, vector<64x128xf32> -> vector<64x128xf32>
    %39 = vector.shape_cast %38 : vector<64x128xf32> to vector<8x8x128xf32>
    %c0_24 = arith.constant 0 : index
    %c2 = arith.constant 2 : index
    %c0_25 = arith.constant 0 : index
    %c0_26 = arith.constant 0 : index
    %40 = vector.load %arg5[%c0_24, %c2, %c0_25, %c0_26] : memref<8x4x8x128xf32, #tpu.memory_space<vmem>>, vector<8x1x8x128xf32>
    %41 = vector.shape_cast %40 : vector<8x1x8x128xf32> to vector<8x8x128xf32>
    %42 = vector.shape_cast %39 : vector<8x8x128xf32> to vector<8x1x8x128xf32>
    tpu.vector_store %arg5[%c0_24, %c2, %c0_25, %c0_26], %42 {strides = array<i32>} : memref<8x4x8x128xf32, #tpu.memory_space<vmem>>, vector<8x1x8x128xf32>,
    %c0_27 = arith.constant 0 : index
    %c384 = arith.constant 384 : index
    %43 = vector.load %arg4[%c0_27, %c384] : memref<32x512xbf16, #tpu.memory_space<vmem>>, vector<32x128xbf16>
    %cst_28 = arith.constant dense<0.000000e+00> : vector<64x128xf32>
    %44 = tpu.matmul %24, %43, %cst_28 {dimension_numbers = #tpu.dot_dimension_numbers<[1], [0], [0], [1], [0, 0, 1, 1], [], []>} : vector<64x32xbf16>, vector<32x128xbf16>, vector<64x128xf32> -> vector<64x128xf32>
    %45 = vector.shape_cast %44 : vector<64x128xf32> to vector<8x8x128xf32>
    %c0_29 = arith.constant 0 : index
    %c3 = arith.constant 3 : index
    %c0_30 = arith.constant 0 : index
    %c0_31 = arith.constant 0 : index
    %46 = vector.load %arg5[%c0_29, %c3, %c0_30, %c0_31] : memref<8x4x8x128xf32, #tpu.memory_space<vmem>>, vector<8x1x8x128xf32>
    %47 = vector.shape_cast %46 : vector<8x1x8x128xf32> to vector<8x8x128xf32>
    %48 = vector.shape_cast %45 : vector<8x8x128xf32> to vector<8x1x8x128xf32>
    tpu.vector_store %arg5[%c0_29, %c3, %c0_30, %c0_31], %48 {strides = array<i32>} : memref<8x4x8x128xf32, #tpu.memory_space<vmem>>, vector<8x1x8x128xf32>,
    return
  }
  func.func @transform_0(%arg0: i32) -> (i32, i32, i32) {
    %c0_i32 = arith.constant 0 : i32
    %c0_i32_0 = arith.constant 0 : i32
    %c0_i32_1 = arith.constant 0 : i32
    return %arg0, %c0_i32, %c0_i32_0 : i32, i32, i32
  }
  func.func @transform_1(%arg0: i32) -> (i32, i32) {
    %c0_i32 = arith.constant 0 : i32
    %c0_i32_0 = arith.constant 0 : i32
    %c0_i32_1 = arith.constant 0 : i32
    return %c0_i32, %c0_i32_0 : i32, i32
  }
  func.func @transform_2(%arg0: i32) -> (i32, i32) {
    %c0_i32 = arith.constant 0 : i32
    %c0_i32_0 = arith.constant 0 : i32
    %c0_i32_1 = arith.constant 0 : i32
    return %c0_i32, %c0_i32_0 : i32, i32
  }
  func.func @transform_3(%arg0: i32) -> (i32, i32) {
    %c0_i32 = arith.constant 0 : i32
    %c0_i32_0 = arith.constant 0 : i32
    %c0_i32_1 = arith.constant 0 : i32
    return %c0_i32, %c0_i32_0 : i32, i32
  }
  func.func @transform_4(%arg0: i32) -> (i32, i32, i32, i32) {
    %c0_i32 = arith.constant 0 : i32
    %c0_i32_0 = arith.constant 0 : i32
    %c0_i32_1 = arith.constant 0 : i32
    %c0_i32_2 = arith.constant 0 : i32
    return %arg0, %c0_i32, %c0_i32_0, %c0_i32_1 : i32, i32, i32, i32
  }
}

</mosaic_0001>

<bundles_post_ra>
// kernel: final_patch_expand_x4.1
= control target key start
LH: loop header
LB: loop body
LE: loop exit
PB: predicated region body
PF: predicated region fallthrough
CT: control target
= control target key end

     0   :  { %s865_s15 = smov 0   ;;  %s1115_s0 = inlined_call_operand.vmem [shape: f32[16,8,32], index: 0, kind: input, shape index: {}]   ;;  %s1116_s1 = inlined_call_operand.vmem [shape: f32[1,32], index: 1, kind: input, shape index: {}]   ;;  %s1117_s2 = inlined_call_operand.vmem [shape: f32[1,32], index: 2, kind: input, shape index: {}]   ;;  %s1118_s3 = inlined_call_operand.vmem [shape: bf16[32,512], index: 3, kind: input, shape index: {}]   ;;  %s1119_s4 = inlined_call_operand.vmem [shape: f32[16,4,8,128], index: 4, kind: output, shape index: {}]  }
   0x1 LB: > { %s709_s16 = sadd.s32 4294967295, %s837_s15   ;;  %p713_p0 = scmp.ge.s32.totalorder %s837_s15, 1  ;;  %s837_s15 = sphi %s865_s15, %s14_s15  }
   0x2   : > { %p163_p1 = scmp.lt.s32.totalorder %s837_s15, 3 }
   0x4   : > { %p164_p2 = pnand %p713_p0, %p163_p1 }
   0x5   : > { %s714_s17 = sshll.u32 (!%p164_p2), %s709_s16, 3 }
   0x6   : > { %167 = sbr.rel (%p164_p2) target bundleno = 560 (0x230), region = 36  ;;  %p191_p3 = scmp.lt.s32.totalorder (!%p164_p2), %s714_s17, 15 }
   0xb   : > { %s1121_s17 = smov (!%p191_p3, %s714_s17), 15  ;;  %vm212_vm0 = vcmask 261120   ;;  %v839_v14 = vmov 32.0   ;;  %v725_v58 = vld [vmem:[%s1118_s3 + $0x20] sm:$0xf] }
   0xc   : > { %s715_s18 = sshll.u32 %s1121_s17, 3  ;;  %813 = vrcp.f32 %v839_v14  ;;  %v795_v59 = vld [vmem:[%s1118_s3 + $0x2c] sm:$0xf0]  ;;  %v737_v60 = vld [vmem:[%s1118_s3 + $0x24] sm:$0xf]  ;;  %s793_s8 = sshll.u32 %s1121_s17, 5 }
   0xd   : > { %s879_s21 = scalar_lea.vmem %s1115_s0, %s715_s18  ;;  %v726_v61 = vor.u32 %v795_v59, %v725_v58  ;;  %v797_v62 = vld [vmem:[%s1118_s3 + $0x30] sm:$0xf0]  ;;  %v757_v63 = vld [vmem:[%s1118_s3 + $0x28] sm:$0xf]  ;;  %s1076_s11 = scalar_lea.vmem %s1119_s4, %s793_s8 }
   0xe   : > { %v208_v0 = vld [vmem:[%s879_s21 + $0x20] sm:$0xff]  ;;  %v206_v1 = vld [vmem:[%s879_s21 + $0x10] sm:$0xff]  ;;  %v209_v6 = vld [vmem:[%s879_s21 + $0x28] sm:$0xff] }
   0xf   : > { %v204_v2 = vld [vmem:[%s879_s21] sm:$0xff]  ;;  %v225_v3 = vsel %vm212_vm0, %v208_v0, 0.0  ;;  %v219_v4 = vsel %vm212_vm0, %v206_v1, 0.0  ;;  %v207_v7 = vld [vmem:[%s879_s21 + $0x18] sm:$0xff]  ;;  %v205_v8 = vld [vmem:[%s879_s21 + $0x8] sm:$0xff]  ;;  %v228_v9 = vsel %vm212_vm0, %v209_v6, 0.0  ;;  %458 = vmatpush.bf16.msra.mxu0 %v726_v61 }
  0x10   : > { %v213_v5 = vsel %vm212_vm0, %v204_v2, 0.0  ;;  %226 = vadd.xlane.f32.xlu2 %v225_v3  ;;  %220 = vadd.xlane.f32.xlu1 %v219_v4  ;;  %v222_v10 = vsel %vm212_vm0, %v207_v7, 0.0  ;;  %v216_v11 = vsel %vm212_vm0, %v205_v8, 0.0  ;;  %v210_v12 = vld [vmem:[%s879_s21 + $0x30] sm:$0xff]  ;;  %v910_v36 = vld [vmem:[%s879_s21 + $0x38] sm:$0xff] }
  0x11   : > { %214 = vadd.xlane.f32.xlu0 %v213_v5  ;;  %v231_v13 = vsel %vm212_vm0, %v210_v12, 0.0  ;;  %v234_v41 = vsel %vm212_vm0, %v910_v36, 0.0  ;;  %v777_v4 = vld [vmem:[%s1118_s3 + $0x2c] sm:$0xf]  ;;  %v801_v5 = vld [vmem:[%s1118_s3 + $0x38] sm:$0xf0] }
  0x12   : > { %v814_v15 = vpop.eup %813  ;;  %v753_v14 = vld [vmem:[%s1118_s3 + $0x8] sm:$0xf] }
  0x13   : > { %v238_v16 = vmul.f32 32.0, %v814_v15  ;;  %vm242_vm1 = vweird.f32 %v814_v15 }
  0x15   : > { %v239_v17 = vsub.f32 1.0, %v238_v16  ;;  %v798_v16 = vld [vmem:[%s1118_s3 + $0x14] sm:$0xf0] }
  0x17   : > { %v240_v18 = vmul.f32 %v814_v15, %v239_v17  ;;  %v773_v17 = vld [vmem:[%s1118_s3 + $0xc] sm:$0xf] }
  0x18   : > { %229 = vadd.xlane.f32.xlu2 %v228_v9  ;;  %223 = vadd.xlane.f32.xlu1 %v222_v10  ;;  %v794_v9 = vld [vmem:[%s1118_s3 + $0xc] sm:$0xf0]  ;;  %v733_v10 = vld [vmem:[%s1118_s3 + $0x4] sm:$0xf] }
  0x19   : > { %217 = vadd.xlane.f32.xlu0 %v216_v11  ;;  %v241_v19 = vadd.f32 %v814_v15, %v240_v18  ;;  %v800_v18 = vld [vmem:[%s1118_s3 + $0x18] sm:$0xf0] }
  0x1b   : > { %v895_v20 = vsel %vm242_vm1, %v814_v15, %v241_v19  ;;  %v754_v19 = vor.u32 %v798_v16, %v753_v14 }
  0x20   : > { %232 = vadd.xlane.f32.xlu2 %v231_v13  ;;  %v796_v13 = vld [vmem:[%s1118_s3 + $0x10] sm:$0xf0] }
  0x21   : > { %v734_v15 = vor.u32 %v796_v13, %v733_v10 }
  0x83   : > { %v227_v21 = vpop.xlane.xlu2 %226  ;;  %v221_v22 = vpop.xlane.xlu1 %220 }
  0x84   : > { %v215_v23 = vpop.xlane.xlu0 %214  ;;  %v248_v32 = vmul.f32 %v895_v20, %v227_v21  ;;  %v246_v33 = vmul.f32 %v895_v20, %v221_v22  ;;  %v774_v21 = vor.u32 %v800_v18, %v773_v17 }
  0x85   : > { %v244_v24 = vmul.f32 %v895_v20, %v215_v23 }
  0x86   : > { %v916_v39 = vsub.f32 %v208_v0, %v248_v32  ;;  %v918_v40 = vsub.f32 %v206_v1, %v246_v33  ;;  %v799_v0 = vld [vmem:[%s1118_s3 + $0x34] sm:$0xf0] }
  0x87   : > { %v898_v25 = vsub.f32 %v204_v2, %v244_v24  ;;  %v738_v2 = vor.u32 %v797_v62, %v737_v60  ;;  %v758_v3 = vor.u32 %v799_v0, %v757_v63 }
  0x88   : > { %v264_v48 = vmul.f32 %v916_v39, %v916_v39  ;;  %v262_v49 = vmul.f32 %v918_v40, %v918_v40 }
  0x89   : > { %v260_v26 = vmul.f32 %v898_v25, %v898_v25  ;;  %511 = vmatpush.bf16.msra.mxu1 %v738_v2  ;;  %565 = vmatpush.bf16.msra.mxu2 %v758_v3 }
  0x8a   : > { %v280_v53 = vsel %vm212_vm0, %v264_v48, 0.0  ;;  %v274_v54 = vsel %vm212_vm0, %v262_v49, 0.0 }
  0x8b   : > { %v230_v27 = vpop.xlane.xlu2 %229  ;;  %v224_v28 = vpop.xlane.xlu1 %223  ;;  %v268_v29 = vsel %vm212_vm0, %v260_v26, 0.0 }
  0x8c   : > { %v247_v30 = vmul.f32 %v895_v20, %v224_v28  ;;  %269 = vadd.xlane.f32.xlu0 %v268_v29  ;;  %v218_v31 = vpop.xlane.xlu0 %217  ;;  %v249_v47 = vmul.f32 %v895_v20, %v230_v27 }
  0x8d   : > { %v245_v34 = vmul.f32 %v895_v20, %v218_v31  ;;  %512 = vmatpush.bf16.msra.mxu1 %v734_v15  ;;  %566 = vmatpush.bf16.msra.mxu2 %v754_v19 }
  0x8e   : > { %v907_v35 = vsub.f32 %v207_v7, %v247_v30  ;;  %v936_v52 = vsub.f32 %v209_v6, %v249_v47  ;;  %v778_v7 = vor.u32 %v801_v5, %v777_v4  ;;  %v1020_v4 = vld [vmem:[%s1116_s1] ss:$0 sm:$0xff] }
  0x8f   : > { %v912_v37 = vsub.f32 %v205_v8, %v245_v34  ;;  %v721_v8 = vld [vmem:[%s1118_s3] sm:$0xf] }
  0x90   : > { %v263_v38 = vmul.f32 %v907_v35, %v907_v35  ;;  %v265_v56 = vmul.f32 %v936_v52, %v936_v52  ;;  %619 = vmatpush.bf16.msra.mxu3 %v778_v7 }
  0x91   : > { %v261_v42 = vmul.f32 %v912_v37, %v912_v37 }
  0x92   : > { %v277_v43 = vsel %vm212_vm0, %v263_v38, 0.0  ;;  %v283_v57 = vsel %vm212_vm0, %v265_v56, 0.0 }
  0x93   : > { %v233_v44 = vpop.xlane.xlu2 %232  ;;  %278 = vadd.xlane.f32.xlu2 %v277_v43  ;;  %v271_v45 = vsel %vm212_vm0, %v261_v42, 0.0 }
  0x94   : > { %v250_v46 = vmul.f32 %v895_v20, %v233_v44  ;;  %235 = vadd.xlane.f32.xlu0 %v234_v41  ;;  %272 = vadd.xlane.f32.xlu1 %v271_v45 }
  0x95   : > { %620 = vmatpush.bf16.msra.mxu3 %v774_v21 }
  0x96   : > { %v932_v50 = vsub.f32 %v210_v12, %v250_v46  ;;  %v722_v12 = vor.u32 %v794_v9, %v721_v8 }
  0x98   : > { %v266_v51 = vmul.f32 %v932_v50, %v932_v50  ;;  %459 = vmatpush.bf16.msra.mxu0 %v722_v12 }
  0x9a   : > { %v286_v55 = vsel %vm212_vm0, %v266_v51, 0.0 }
  0x9b   : > { %287 = vadd.xlane.f32.xlu2 %v286_v55 }
  0x9c   : > { %281 = vadd.xlane.f32.xlu0 %v280_v53  ;;  %275 = vadd.xlane.f32.xlu1 %v274_v54 }
  0xa4   : > { %284 = vadd.xlane.f32.xlu1 %v283_v57 }
  0xff   : > { %v270_v1 = vpop.xlane.xlu0 %269 }
 0x100   : > { %v292_v6 = vmul.f32 %v270_v1, %v895_v20 }
 0x102   : > { %v300_v11 = vadd.f32 1e-05, %v292_v6 }
 0x104   : > { %815 = vrsqrt.f32 %v300_v11  ;;  %vm314_vm3 = vweird.f32 %v300_v11 }
 0x106   : > { %v279_v22 = vpop.xlane.xlu2 %278 }
 0x107   : > { %v295_v23 = vmul.f32 %v279_v22, %v895_v20  ;;  %v273_v24 = vpop.xlane.xlu1 %272  ;;  %v236_v26 = vpop.xlane.xlu0 %235 }
 0x108   : > { %v293_v27 = vmul.f32 %v273_v24, %v895_v20  ;;  %v251_v28 = vmul.f32 %v895_v20, %v236_v26 }
 0x109   : > { %v996_v29 = vadd.f32 1e-05, %v295_v23 }
 0x10a   : > { %v816_v30 = vpop.eup %815  ;;  %v301_v31 = vadd.f32 1e-05, %v293_v27  ;;  %v999_v32 = vsub.f32 %v910_v36, %v251_v28 }
 0x10b   : > { %v309_v33 = vmul.f32 %v816_v30, %v300_v11  ;;  %817 = vrsqrt.f32 %v996_v29  ;;  %vm315_vm2 = vweird.f32 %v816_v30  ;;  %vm344_vm10 = vweird.f32 %v996_v29 }
 0x10c   : > { %819 = vrsqrt.f32 %v301_v31  ;;  %v267_v34 = vmul.f32 %v999_v32, %v999_v32  ;;  %vm316_vm4 = vmor %vm314_vm3, %vm315_vm2  ;;  %vm324_vm5 = vweird.f32 %v301_v31 }
 0x10d   : > { %v310_v38 = vmul.f32 %v816_v30, %v309_v33 }
 0x10e   : > { %v289_v41 = vsel %vm212_vm0, %v267_v34, 0.0 }
 0x10f   : > { %v311_v42 = vmul.f32 0.5, %v310_v38  ;;  %v276_v43 = vpop.xlane.xlu1 %275  ;;  %290 = vadd.xlane.f32.xlu0 %v289_v41  ;;  %v282_v45 = vpop.xlane.xlu0 %281 }
 0x110   : > { %v294_v44 = vmul.f32 %v276_v43, %v895_v20  ;;  %v296_v51 = vmul.f32 %v282_v45, %v895_v20 }
 0x111   : > { %v1006_v46 = vpop.eup %817  ;;  %v312_v36 = vsub.f32 1.5, %v311_v42 }
 0x112   : > { %v820_v47 = vpop.eup %819  ;;  %v302_v48 = vadd.f32 1e-05, %v294_v44  ;;  %v339_v54 = vmul.f32 %v1006_v46, %v996_v29  ;;  %v1011_v57 = vadd.f32 1e-05, %v296_v51  ;;  %vm345_vm11 = vweird.f32 %v1006_v46 }
 0x113   : > { %v319_v49 = vmul.f32 %v820_v47, %v301_v31  ;;  %v313_v53 = vmul.f32 %v816_v30, %v312_v36  ;;  %vm325_vm6 = vweird.f32 %v820_v47  ;;  %vm346_vm13 = vmor %vm344_vm10, %vm345_vm11 }
 0x114   : > { %821 = vrsqrt.f32 %v302_v48  ;;  %v340_v60 = vmul.f32 %v1006_v46, %v339_v54  ;;  %vm326_vm7 = vmor %vm324_vm5, %vm325_vm6  ;;  %vm334_vm8 = vweird.f32 %v302_v48  ;;  %vm354_vm1 = vweird.f32 %v1011_v57 }
 0x115   : > { %v320_v55 = vmul.f32 %v820_v47, %v319_v49  ;;  %v317_v59 = vsel %vm316_vm4, %v816_v30, %v313_v53  ;;  %823 = vrsqrt.f32 %v1011_v57 }
 0x116   : > { %v388_v1 = vmul.f32 %v317_v59, %v898_v25  ;;  %v341_v5 = vmul.f32 0.5, %v340_v60  ;;  %v1027_v25 = vld [vmem:[%s1117_s2] ss:$0 sm:$0xff] }
 0x117   : > { %v321_v56 = vmul.f32 0.5, %v320_v55  ;;  %v285_v58 = vpop.xlane.xlu1 %284 }
 0x118   : > { %v297_v61 = vmul.f32 %v285_v58, %v895_v20  ;;  %v400_v10 = vmul.f32 %v1020_v4, %v388_v1  ;;  %v342_v11 = vsub.f32 1.5, %v341_v5 }
 0x119   : > { %v322_v62 = vsub.f32 1.5, %v321_v56 }
 0x11a   : > { %v822_v63 = vpop.eup %821  ;;  %v305_v0 = vadd.f32 1e-05, %v297_v61  ;;  %v412_v17 = vadd.f32 %v1027_v25, %v400_v10  ;;  %v343_v18 = vmul.f32 %v1006_v46, %v342_v11 }
 0x11b   : > { %v323_v2 = vmul.f32 %v820_v47, %v322_v62  ;;  %v329_v3 = vmul.f32 %v822_v63, %v302_v48  ;;  %vm335_vm9 = vweird.f32 %v822_v63  ;;  %v824_v13 = vpop.eup %823 }
 0x11c   : > { %825 = vrsqrt.f32 %v305_v0  ;;  %vm336_vm12 = vmor %vm334_vm8, %vm335_vm9  ;;  %v349_v19 = vmul.f32 %v824_v13, %v1011_v57  ;;  %v347_v26 = vsel %vm346_vm13, %v1006_v46, %v343_v18  ;;  %vm364_vm14 = vweird.f32 %v305_v0 }
 0x11d   : > { %v327_v6 = vsel %vm326_vm7, %v820_v47, %v323_v2  ;;  %v330_v7 = vmul.f32 %v822_v63, %v329_v3  ;;  %v391_v30 = vmul.f32 %v347_v26, %v907_v35  ;;  %vm355_vm2 = vweird.f32 %v824_v13 }
 0x11e   : > { %v389_v8 = vmul.f32 %v327_v6, %v912_v37  ;;  %v350_v27 = vmul.f32 %v824_v13, %v349_v19  ;;  %vm356_vm4 = vmor %vm354_vm1, %vm355_vm2 }
 0x11f   : > { %v331_v9 = vmul.f32 0.5, %v330_v7  ;;  %v403_v38 = vmul.f32 %v1020_v4, %v391_v30 }
 0x120   : > { %v401_v12 = vmul.f32 %v1020_v4, %v389_v8  ;;  %v351_v31 = vmul.f32 0.5, %v350_v27 }
 0x121   : > { %v332_v14 = vsub.f32 1.5, %v331_v9 }
 0x122   : > { %v413_v37 = vadd.f32 %v1027_v25, %v401_v12  ;;  %v826_v15 = vpop.eup %825  ;;  %v352_v41 = vsub.f32 1.5, %v351_v31 }
 0x123   : > { %v333_v16 = vmul.f32 %v822_v63, %v332_v14  ;;  %v359_v21 = vmul.f32 %v826_v15, %v305_v0  ;;  %vm365_vm15 = vweird.f32 %v826_v15 }
 0x124   : > { %v420_v22 = vpack.c.bf16 %v413_v37, %v412_v17  ;;  %vm366_vm3 = vmor %vm364_vm14, %vm365_vm15  ;;  %v353_v44 = vmul.f32 %v824_v13, %v352_v41 }
 0x125   : > { %v337_v23 = vsel %vm336_vm12, %v822_v63, %v333_v16  ;;  %v360_v24 = vmul.f32 %v826_v15, %v359_v21 }
 0x126   : > { %727 = vmatmul.msk.bf16.vlgmr.msra.gmra.mxu0 %vm212_vm0, %v420_v22  ;;  %739 = vmatmul.msk.bf16.vlgmr.msra.gmra.mxu1 %vm212_vm0, %v420_v22  ;;  %v390_v28 = vmul.f32 %v337_v23, %v918_v40  ;;  %v415_v40 = vadd.f32 %v1027_v25, %v403_v38  ;;  %v357_v46 = vsel %vm356_vm4, %v824_v13, %v353_v44 }
 0x127   : > { %759 = vmatmul.msk.bf16.vlgmr.msra.gmra.mxu2 %vm212_vm0, %v420_v22  ;;  %779 = vmatmul.msk.bf16.vlgmr.msra.gmra.mxu3 %vm212_vm0, %v420_v22  ;;  %v361_v29 = vmul.f32 0.5, %v360_v24  ;;  %v392_v47 = vmul.f32 %v357_v46, %v916_v39 }
 0x128   : > { %v402_v33 = vmul.f32 %v1020_v4, %v390_v28 }
 0x129   : > { %v362_v34 = vsub.f32 1.5, %v361_v29  ;;  %v404_v49 = vmul.f32 %v1020_v4, %v392_v47 }
 0x12a   : > { %v414_v42 = vadd.f32 %v1027_v25, %v402_v33 }
 0x12b   : > { %v363_v43 = vmul.f32 %v826_v15, %v362_v34  ;;  %v416_v53 = vadd.f32 %v1027_v25, %v404_v49 }
 0x12c   : > { %v421_v35 = vpack.c.bf16 %v415_v40, %v414_v42 }
 0x12d   : > { %v367_v45 = vsel %vm366_vm3, %v826_v15, %v363_v43 }
 0x12e   : > { %v393_v36 = vmul.f32 %v367_v45, %v936_v52  ;;  %v288_v52 = vpop.xlane.xlu2 %287 }
 0x12f   : > { %v298_v39 = vmul.f32 %v288_v52, %v895_v20 }
 0x130   : > { %v405_v48 = vmul.f32 %v1020_v4, %v393_v36 }
 0x131   : > { %v306_v55 = vadd.f32 1e-05, %v298_v39 }
 0x132   : > { %v417_v51 = vadd.f32 %v1027_v25, %v405_v48 }
 0x133   : > { %827 = vrsqrt.f32 %v306_v55  ;;  %vm374_vm5 = vweird.f32 %v306_v55 }
 0x134   : > { %v422_v54 = vpack.c.bf16 %v417_v51, %v416_v53 }
 0x136   : > { %728 = vmatmul.msk.bf16.gmra.mxu0 %vm212_vm0, %v421_v35  ;;  %740 = vmatmul.msk.bf16.gmra.mxu1 %vm212_vm0, %v421_v35 }
 0x137   : > { %760 = vmatmul.msk.bf16.gmra.mxu2 %vm212_vm0, %v421_v35  ;;  %780 = vmatmul.msk.bf16.gmra.mxu3 %vm212_vm0, %v421_v35 }
 0x139   : > { %v828_v56 = vpop.eup %827 }
 0x13a   : > { %v369_v57 = vmul.f32 %v828_v56, %v306_v55  ;;  %vm375_vm6 = vweird.f32 %v828_v56 }
 0x13b   : > { %vm376_vm7 = vmor %vm374_vm5, %vm375_vm6 }
 0x13c   : > { %v370_v58 = vmul.f32 %v828_v56, %v369_v57 }
 0x13e   : > { %v371_v62 = vmul.f32 0.5, %v370_v58 }
 0x140   : > { %v372_v63 = vsub.f32 1.5, %v371_v62 }
 0x142   : > { %v373_v1 = vmul.f32 %v828_v56, %v372_v63 }
 0x144   : > { %v377_v5 = vsel %vm376_vm7, %v828_v56, %v373_v1 }
 0x145   : > { %v394_v8 = vmul.f32 %v377_v5, %v932_v50 }
 0x146   : > { %729 = vmatmul.msk.bf16.gmra.mxu0 %vm212_vm0, %v422_v54  ;;  %741 = vmatmul.msk.bf16.gmra.mxu1 %vm212_vm0, %v422_v54 }
 0x147   : > { %761 = vmatmul.msk.bf16.gmra.mxu2 %vm212_vm0, %v422_v54  ;;  %781 = vmatmul.msk.bf16.gmra.mxu3 %vm212_vm0, %v422_v54  ;;  %v406_v11 = vmul.f32 %v1020_v4, %v394_v8 }
 0x149   : > { %v418_v13 = vadd.f32 %v1027_v25, %v406_v11 }
 0x182   : > { %v291_v59 = vpop.xlane.xlu0 %290 }
 0x183   : > { %v299_v60 = vmul.f32 %v291_v59, %v895_v20 }
 0x185   : > { %v307_v61 = vadd.f32 1e-05, %v299_v60 }
 0x187   : > { %829 = vrsqrt.f32 %v307_v61  ;;  %vm384_vm9 = vweird.f32 %v307_v61 }
 0x18d   : > { %v830_v0 = vpop.eup %829 }
 0x18e   : > { %v379_v2 = vmul.f32 %v830_v0, %v307_v61  ;;  %vm385_vm8 = vweird.f32 %v830_v0 }
 0x18f   : > { %vm386_vm10 = vmor %vm384_vm9, %vm385_vm8 }
 0x190   : > { %v380_v3 = vmul.f32 %v830_v0, %v379_v2 }
 0x192   : > { %v381_v6 = vmul.f32 0.5, %v380_v3 }
 0x194   : > { %v382_v7 = vsub.f32 1.5, %v381_v6 }
 0x196   : > { %v383_v9 = vmul.f32 %v830_v0, %v382_v7 }
 0x198   : > { %v387_v20 = vsel %vm386_vm10, %v830_v0, %v383_v9 }
 0x199   : > { %v395_v10 = vmul.f32 %v387_v20, %v999_v32 }
 0x19b   : > { %v407_v12 = vmul.f32 %v1020_v4, %v395_v10 }
 0x19d   : > { %v419_v14 = vadd.f32 %v1027_v25, %v407_v12 }
 0x19f   : > { %v423_v37 = vpack.c.bf16 %v419_v14, %v418_v13 }
 0x1a1   : > { %730 = vmatmul.msk.bf16.gmra.mxu0 %vm212_vm0, %v423_v37  ;;  %742 = vmatmul.msk.bf16.gmra.mxu1 %vm212_vm0, %v423_v37 }
 0x1a2   : > { %762 = vmatmul.msk.bf16.gmra.mxu2 %vm212_vm0, %v423_v37  ;;  %782 = vmatmul.msk.bf16.gmra.mxu3 %vm212_vm0, %v423_v37 }
 0x1a3   : > { %v461_v50 = vpop.f32.mrf.mxu0  ;;  %v514_v32 = vpop.f32.mrf.mxu1 }
 0x1a4   : > { %481 = vst [vmem:[%s1076_s11] sm:$0xff] %v461_v50 }
 0x1a5   : > { %743 = vst [vmem:[%s1076_s11 + $0x8] sm:$0xff] %v514_v32 }
 0x1aa   : > { %v568_v4 = vpop.f32.mrf.mxu2  ;;  %v622_v25 = vpop.f32.mrf.mxu3 }
 0x1ab   : > { %763 = vst [vmem:[%s1076_s11 + $0x10] sm:$0xff] %v568_v4  ;;  %v463_v15 = vpop.f32.mrf.mxu0  ;;  %v516_v16 = vpop.f32.mrf.mxu1 }
 0x1ac   : > { %783 = vst [vmem:[%s1076_s11 + $0x18] sm:$0xff] %v622_v25 }
 0x1ad   : > { %482 = vst [vmem:[%s1076_s11 + $0x20] sm:$0xff] %v463_v15 }
 0x1ae   : > { %744 = vst [vmem:[%s1076_s11 + $0x28] sm:$0xff] %v516_v16 }
 0x1b2   : > { %v570_v17 = vpop.f32.mrf.mxu2  ;;  %v624_v18 = vpop.f32.mrf.mxu3 }
 0x1b3   : > { %764 = vst [vmem:[%s1076_s11 + $0x30] sm:$0xff] %v570_v17  ;;  %v466_v19 = vpop.f32.mrf.mxu0  ;;  %v519_v21 = vpop.f32.mrf.mxu1 }
 0x1b4   : > { %784 = vst [vmem:[%s1076_s11 + $0x38] sm:$0xff] %v624_v18 }
 0x1b5   : > { %483 = vst [vmem:[%s1076_s11 + $0x40] sm:$0xff] %v466_v19 }
 0x1b6   : > { %745 = vst [vmem:[%s1076_s11 + $0x48] sm:$0xff] %v519_v21 }
 0x1ba   : > { %v573_v22 = vpop.f32.mrf.mxu2  ;;  %v627_v23 = vpop.f32.mrf.mxu3 }
 0x1bb   : > { %765 = vst [vmem:[%s1076_s11 + $0x50] sm:$0xff] %v573_v22  ;;  %v468_v24 = vpop.f32.mrf.mxu0  ;;  %v521_v26 = vpop.f32.mrf.mxu1 }
 0x1bc   : > { %785 = vst [vmem:[%s1076_s11 + $0x58] sm:$0xff] %v627_v23 }
 0x1bd   : > { %484 = vst [vmem:[%s1076_s11 + $0x60] sm:$0xff] %v468_v24 }
 0x1be   : > { %746 = vst [vmem:[%s1076_s11 + $0x68] sm:$0xff] %v521_v26 }
 0x1c2   : > { %v575_v27 = vpop.f32.mrf.mxu2  ;;  %v629_v28 = vpop.f32.mrf.mxu3 }
 0x1c3   : > { %766 = vst [vmem:[%s1076_s11 + $0x70] sm:$0xff] %v575_v27  ;;  %v471_v29 = vpop.f32.mrf.mxu0  ;;  %v524_v30 = vpop.f32.mrf.mxu1 }
 0x1c4   : > { %786 = vst [vmem:[%s1076_s11 + $0x78] sm:$0xff] %v629_v28 }
 0x1c5   : > { %485 = vst [vmem:[%s1076_s11 + $0x80] sm:$0xff] %v471_v29 }
 0x1c6   : > { %747 = vst [vmem:[%s1076_s11 + $0x88] sm:$0xff] %v524_v30 }
 0x1ca   : > { %v578_v31 = vpop.f32.mrf.mxu2  ;;  %v632_v33 = vpop.f32.mrf.mxu3 }
 0x1cb   : > { %767 = vst [vmem:[%s1076_s11 + $0x90] sm:$0xff] %v578_v31  ;;  %v473_v34 = vpop.f32.mrf.mxu0  ;;  %v526_v38 = vpop.f32.mrf.mxu1 }
 0x1cc   : > { %787 = vst [vmem:[%s1076_s11 + $0x98] sm:$0xff] %v632_v33 }
 0x1cd   : > { %486 = vst [vmem:[%s1076_s11 + $0xa0] sm:$0xff] %v473_v34 }
 0x1ce   : > { %748 = vst [vmem:[%s1076_s11 + $0xa8] sm:$0xff] %v526_v38 }
 0x1d2   : > { %v580_v41 = vpop.f32.mrf.mxu2  ;;  %v634_v42 = vpop.f32.mrf.mxu3 }
 0x1d3   : > { %768 = vst [vmem:[%s1076_s11 + $0xb0] sm:$0xff] %v580_v41 }
 0x1d4   : > { %788 = vst [vmem:[%s1076_s11 + $0xb8] sm:$0xff] %v634_v42 }
 0x21e   : > { %v476_v43 = vpop.f32.mrf.mxu0  ;;  %v529_v40 = vpop.f32.mrf.mxu1 }
 0x21f   : > { %487 = vst [vmem:[%s1076_s11 + $0xc0] sm:$0xff] %v476_v43 }
 0x220   : > { %749 = vst [vmem:[%s1076_s11 + $0xc8] sm:$0xff] %v529_v40 }
 0x225   : > { %v583_v44 = vpop.f32.mrf.mxu2  ;;  %v637_v35 = vpop.f32.mrf.mxu3 }
 0x226   : > { %769 = vst [vmem:[%s1076_s11 + $0xd0] sm:$0xff] %v583_v44  ;;  %v478_v45 = vpop.f32.mrf.mxu0  ;;  %v531_v46 = vpop.f32.mrf.mxu1 }
 0x227   : > { %789 = vst [vmem:[%s1076_s11 + $0xd8] sm:$0xff] %v637_v35 }
 0x228   : > { %488 = vst [vmem:[%s1076_s11 + $0xe0] sm:$0xff] %v478_v45 }
 0x229   : > { %750 = vst [vmem:[%s1076_s11 + $0xe8] sm:$0xff] %v531_v46 }
 0x22d   : > { %v585_v36 = vpop.f32.mrf.mxu2  ;;  %v639_v47 = vpop.f32.mrf.mxu3 }
 0x22e   : > { %770 = vst [vmem:[%s1076_s11 + $0xf0] sm:$0xff] %v585_v36 }
 0x22f   : > { %790 = vst [vmem:[%s1076_s11 + $0xf8] sm:$0xff] %v639_v47 }
 0x230 PF: > { %s14_s15 = sadd.s32 1, %s837_s15  }
 0x231   : > { %p11_p4 = scmp.ge.s32.totalorder %s14_s15, 4  }
 0x233   :  { %13 = sbr.rel (!%p11_p4) target bundleno = 1 (0x1), region = 69 }

</bundles_post_ra>
